<compile_context>
chip_gen: v7x
topology: tpu7x:2x2x1
jax: 0.10.0
libtpu: 0.0.40
codegen_flags: <defaults>
</compile_context>

<pallas_src>
import functools

import jax
import jax.numpy as jnp
from jax.experimental import pallas as pl
from jax.experimental.pallas import tpu as pltpu


# ---------------------------------------------------------------------------
# Hardware-aware sizing helpers
# ---------------------------------------------------------------------------

def _device_info():
    """Returns (num_tensorcores, per-core VMEM bytes we are willing to use)."""
    kind = ""
    try:
        kind = jax.devices()[0].device_kind.lower()
    except Exception:
        pass
    is_v7 = ("v7" in kind) or ("7x" in kind)
    if is_v7:                              # 2 TCs/chip, 64 MiB physical VMEM/TC
        return 2, 48 << 20
    if ("v5" in kind) or ("v6" in kind):   # 1 TC/chip, 128 MiB physical VMEM
        return 1, 96 << 20
    return 1, 40 << 20                     # unknown part: stay conservative


def _pick_batch_tile(B, bytes_per_batch, num_cores, pipeline_budget,
                     target_bytes=4 << 20):
    """Largest batch tile whose double-buffered in+out footprint fits the
    budget, aiming at ~target_bytes blocks.  No forced splitting on single-TC
    parts (v5e/v6e); on multi-TC parts (v7x) prefer >= 2 steps per core, but
    only while blocks stay >= ~1 MiB so each core keeps pipelining."""
    max_by_vmem = max(1, pipeline_budget // max(4 * bytes_per_batch, 1))
    bt = max(1, min(B, target_bytes // max(bytes_per_batch, 1), max_by_vmem))
    if num_cores > 1:
        min_steps = 2 * num_cores
        while bt > 1 and B // bt < min_steps and bt * bytes_per_batch > (1 << 20):
            bt -= 1
    while B % bt:          # keep every block full and index maps trivial
        bt -= 1
    return bt


# ---------------------------------------------------------------------------
# Fused single-pass kernel (the common case)
# ---------------------------------------------------------------------------

def _se_fused_kernel(x_ref, w1t_ref, b1_ref, w2t_ref, b2_ref, o_ref):
    """x_ref/o_ref: (Bt, C, HW) blocks — HW lane-dense, C on sublanes."""
    inv_hw = 1.0 / x_ref.shape[-1]

    # Squeeze: global average pool over the spatial (lane) axis.  The f32
    # widening is fused into the reduction (no full-tile f32 copy for bf16).
    pooled = jnp.sum(x_ref[...], axis=-1, dtype=jnp.float32) * inv_hw   # (Bt, C)

    # Excitation: two tiny dense layers (the 1x1 convs).
    C, Cr = w1t_ref.shape
    if C <= 32 and Cr <= 32:
        # Tiny FC: stay on the VPU/XLU (a few-row matmul wastes the MXU and
        # pays push/pop latency for nothing).
        y = jnp.sum(pooled[:, :, None] * w1t_ref[...][None, :, :], axis=1)
        y = jnp.maximum(y + b1_ref[...], 0.0)                           # (Bt, Cr)
        z = jnp.sum(y[:, :, None] * w2t_ref[...][None, :, :], axis=1)
    else:
        # Realistic C (>=64): MXU matmul batched over the Bt rows per step.
        y = jnp.dot(pooled, w1t_ref[...], preferred_element_type=jnp.float32)
        y = jnp.maximum(y + b1_ref[...], 0.0)                           # (Bt, Cr)
        z = jnp.dot(y, w2t_ref[...], preferred_element_type=jnp.float32)
    s = jax.nn.sigmoid(z + b2_ref[...])                                 # (Bt, C)

    # Scale: broadcast channel attention over the spatial lanes.  x is re-read
    # from the ref in its native dtype; only the tiny s is converted.
    o_ref[...] = (x_ref[...] * s.astype(x_ref.dtype)[:, :, None]).astype(o_ref.dtype)


# ---------------------------------------------------------------------------
# Fallback kernels for very large C*HW (single-batch block would blow VMEM)
# ---------------------------------------------------------------------------

def _pool_sum_kernel(x_ref, acc_ref, *, hw_total):
    """Accumulate per-(batch, channel) sums over HW tiles (grid axis 1)."""
    h = pl.program_id(1)
    hwt = x_ref.shape[-1]

    @pl.when(h == 0)
    def _():
        acc_ref[...] = jnp.zeros_like(acc_ref)

    x = x_ref[...]
    # The last HW tile may extend past the array; mask the padded lanes
    # (out-of-bounds reads are unspecified).
    lane = jax.lax.broadcasted_iota(jnp.int32, x.shape, x.ndim - 1)
    x = jnp.where(lane < (hw_total - h * hwt), x, jnp.zeros_like(x))
    acc_ref[...] += jnp.sum(x, axis=-1, dtype=jnp.float32)


def _scale_kernel(x_ref, s_ref, o_ref):
    o_ref[...] = (x_ref[...] * s_ref[...][:, :, None]).astype(o_ref.dtype)


def _se_large(x, w1t, b1r, w2t, b2r, vmem_cap):
    """Two-pass path: HW-tiled pooling kernel -> tiny excitation in jnp ->
    HW-tiled scaling kernel.  Costs 2 reads + 1 write of x, but keeps huge
    feature maps compiling within the VMEM budget."""
    B, C, HW = x.shape
    itemsize = x.dtype.itemsize

    target = 2 << 20
    hwt = max(128, (target // max(C * itemsize, 1)) // 128 * 128)
    hwt = min(hwt, pl.cdiv(HW, 128) * 128)
    n_hw = pl.cdiv(HW, hwt)
    block_bytes = C * hwt * itemsize
    vmem_limit = int(min(vmem_cap, max(6 * block_bytes, 32 << 20)))

    pooled = pl.pallas_call(
        functools.partial(_pool_sum_kernel, hw_total=HW),
        out_shape=jax.ShapeDtypeStruct((B, C), jnp.float32),
        grid_spec=pltpu.PrefetchScalarGridSpec(
            num_scalar_prefetch=0,
            grid=(B, n_hw),
            in_specs=[pl.BlockSpec((1, C, hwt), lambda b, h: (b, 0, h))],
            out_specs=pl.BlockSpec((1, C), lambda b, h: (b, 0)),
        ),
        compiler_params=pltpu.CompilerParams(
            dimension_semantics=("parallel", "arbitrary"),
            vmem_limit_bytes=vmem_limit),
    )(x)

    pooled = pooled * (1.0 / HW)                                     # (B, C)
    y = jnp.maximum(pooled @ w1t + b1r, 0.0)                         # (B, Cr)
    s = jax.nn.sigmoid(y @ w2t + b2r).astype(x.dtype)                # (B, C)

    return pl.pallas_call(
        _scale_kernel,
        out_shape=jax.ShapeDtypeStruct((B, C, HW), x.dtype),
        grid_spec=pltpu.PrefetchScalarGridSpec(
            num_scalar_prefetch=0,
            grid=(B, n_hw),
            in_specs=[pl.BlockSpec((1, C, hwt), lambda b, h: (b, 0, h)),
                      pl.BlockSpec((1, C), lambda b, h: (b, 0))],
            out_specs=pl.BlockSpec((1, C, hwt), lambda b, h: (b, 0, h)),
        ),
        compiler_params=pltpu.CompilerParams(
            dimension_semantics=("parallel", "parallel"),
            vmem_limit_bytes=vmem_limit),
    )(x, s)


# ---------------------------------------------------------------------------
# Public wrapper
# ---------------------------------------------------------------------------

@jax.jit
def se_forward(x_nchw, w1, b1, w2, b2):
    """x_nchw: (B, C, H, W); w1: (Cr, C), b1: (Cr,), w2: (C, Cr), b2: (C,).
    Equivalent to the PyTorch SE.forward."""
    B, C, H, W = x_nchw.shape
    Cr = w1.shape[0]
    HW = H * W

    # Free (contiguous) reshape: NCHW -> (B, C, HW).  No transposes of x.
    x = x_nchw.reshape(B, C, HW)

    # Pre-transpose the tiny weights so the kernel does row-major products.
    w1t = jnp.transpose(w1)            # (C, Cr)
    w2t = jnp.transpose(w2)            # (Cr, C)
    b1r = b1.reshape(1, Cr)
    b2r = b2.reshape(1, C)

    num_cores, vmem_cap = _device_info()
    itemsize = x.dtype.itemsize
    bytes_per_batch = C * HW * itemsize
    pipeline_budget = vmem_cap - (8 << 20)     # headroom for weights/compiler

    if 4 * bytes_per_batch > pipeline_budget:
        # Even a single-batch block, double-buffered in+out, would blow VMEM.
        out = _se_large(x, w1t, b1r, w2t, b2r, vmem_cap)
        return out.reshape(B, C, H, W)

    Bt = _pick_batch_tile(B, bytes_per_batch, num_cores, pipeline_budget)
    block_bytes = Bt * bytes_per_batch
    weight_bytes = 4 * (w1t.size + w2t.size + b1r.size + b2r.size)
    vmem_limit = int(min(vmem_cap,
                         max(4 * block_bytes + weight_bytes + (4 << 20),
                             32 << 20)))

    cost = pl.CostEstimate(
        flops=2 * B * C * HW + 4 * B * C * Cr,         # pool + scale + tiny FCs
        transcendentals=B * C,                         # sigmoid
        bytes_accessed=2 * B * C * HW * itemsize + 2 * weight_bytes,
    )

    out = pl.pallas_call(
        _se_fused_kernel,
        out_shape=jax.ShapeDtypeStruct((B, C, HW), x.dtype),
        grid_spec=pltpu.PrefetchScalarGridSpec(
            num_scalar_prefetch=0,
            grid=(B // Bt,),
            in_specs=[
                pl.BlockSpec((Bt, C, HW), lambda b: (b, 0, 0)),   # x (Bt batches)
                pl.BlockSpec((C, Cr), lambda b: (0, 0)),          # W1^T (full)
                pl.BlockSpec((1, Cr), lambda b: (0, 0)),          # b1
                pl.BlockSpec((Cr, C), lambda b: (0, 0)),          # W2^T (full)
                pl.BlockSpec((1, C), lambda b: (0, 0)),           # b2
            ],
            out_specs=pl.BlockSpec((Bt, C, HW), lambda b: (b, 0, 0)),
        ),
        compiler_params=pltpu.CompilerParams(
            dimension_semantics=("parallel",),
            vmem_limit_bytes=vmem_limit),
        cost_estimate=cost,
    )(x, w1t, b1r, w2t, b2r)

    # Free reshape back to NCHW.
    return out.reshape(B, C, H, W)


def se_reference(x_nchw, w1, b1, w2, b2):
    """Pure-JAX reference mirroring the PyTorch forward."""
    pooled = jnp.mean(x_nchw, axis=(2, 3))                         # (B, C)
    y = jnp.maximum(pooled @ w1.T + b1, 0.0)                       # (B, Cr)
    s = jax.nn.sigmoid(y @ w2.T + b2)                              # (B, C)
    return x_nchw * s[:, :, None, None]


if __name__ == "__main__":
    # Small shapes consistent with the module: channels=4, reduction=1.
    B, C, H, W = 2, 4, 16, 16
    reduction = 1
    Cr = C // reduction

    key = jax.random.PRNGKey(0)
    kx, k1, k2, k3, k4 = jax.random.split(key, 5)

    x = jax.random.normal(kx, (B, C, H, W), dtype=jnp.float32)
    # Deterministic synthetic parameters (Conv2d 1x1 weights squeezed to 2-D).
    w1 = jax.random.normal(k1, (Cr, C), dtype=jnp.float32) * 0.1   # fc1.weight
    b1 = jax.random.normal(k2, (Cr,), dtype=jnp.float32) * 0.1     # fc1.bias
    w2 = jax.random.normal(k3, (C, Cr), dtype=jnp.float32) * 0.1   # fc2.weight
    b2 = jax.random.normal(k4, (C,), dtype=jnp.float32) * 0.1      # fc2.bias

    ref = se_reference(x, w1, b1, w2, b2)

    out = jax.block_until_ready(se_forward(x, w1, b1, w2, b2))

    assert out.shape == (B, C, H, W)
    assert jnp.allclose(out, ref, atol=1e-5, rtol=1e-5), "mismatch vs reference"

    print("KERNEL_OK")
</pallas_src>

<mosaic_0001>
module attributes {stable_mosaic.version = 11 : i64} {
  func.func @_se_fused_kernel(%arg0: i32, %arg1: memref<2x4x256xf32, #tpu.memory_space<vmem>>, %arg2: memref<4x4xf32, #tpu.memory_space<vmem>>, %arg3: memref<1x4xf32, #tpu.memory_space<vmem>>, %arg4: memref<4x4xf32, #tpu.memory_space<vmem>>, %arg5: memref<1x4xf32, #tpu.memory_space<vmem>>, %arg6: memref<2x4x256xf32, #tpu.memory_space<vmem>>) attributes {dimension_semantics = [#tpu.dimension_semantics<parallel>], iteration_bounds = array<i64: 1>, scalar_prefetch = 0 : i64, scratch_operands = 0 : i64, tpu.core_type = #tpu.core_type<tc>, window_params = [{transform_indices = @transform_0, window_bounds = array<i64: 2, 4, 256>}, {pipeline_mode = #tpu.pipeline_mode<synchronous>, transform_indices = @transform_1, window_bounds = array<i64: 4, 4>}, {pipeline_mode = #tpu.pipeline_mode<synchronous>, transform_indices = @transform_2, window_bounds = array<i64: 1, 4>}, {pipeline_mode = #tpu.pipeline_mode<synchronous>, transform_indices = @transform_3, window_bounds = array<i64: 4, 4>}, {pipeline_mode = #tpu.pipeline_mode<synchronous>, transform_indices = @transform_4, window_bounds = array<i64: 1, 4>}, {transform_indices = @transform_5, window_bounds = array<i64: 2, 4, 256>}]} {
    %c0 = arith.constant 0 : index
    %c0_0 = arith.constant 0 : index
    %c0_1 = arith.constant 0 : index
    %0 = vector.load %arg1[%c0, %c0_0, %c0_1] : memref<2x4x256xf32, #tpu.memory_space<vmem>>, vector<2x4x256xf32>
    %cst = arith.constant dense<0.000000e+00> : vector<2x4xf32>
    %1 = vector.multi_reduction <add>, %0, %cst [2] : vector<2x4x256xf32> to vector<2x4xf32>
    %cst_2 = arith.constant 3.906250e-03 : f32
    %2 = vector.broadcast %cst_2 : f32 to vector<2x4xf32>
    %3 = arith.mulf %1, %2 : vector<2x4xf32>
    %4 = vector.shape_cast %3 : vector<2x4xf32> to vector<2x4x1xf32>
    %c0_3 = arith.constant 0 : index
    %c0_4 = arith.constant 0 : index
    %5 = vector.load %arg2[%c0_3, %c0_4] : memref<4x4xf32, #tpu.memory_space<vmem>>, vector<4x4xf32>
    %6 = vector.shape_cast %5 : vector<4x4xf32> to vector<1x4x4xf32>
    %7 = vector.broadcast %4 : vector<2x4x1xf32> to vector<2x4x4xf32>
    %8 = vector.broadcast %6 : vector<1x4x4xf32> to vector<2x4x4xf32>
    %9 = arith.mulf %7, %8 : vector<2x4x4xf32>
    %cst_5 = arith.constant dense<0.000000e+00> : vector<2x4xf32>
    %10 = vector.multi_reduction <add>, %9, %cst_5 [1] : vector<2x4x4xf32> to vector<2x4xf32>
    %c0_6 = arith.constant 0 : index
    %c0_7 = arith.constant 0 : index
    %11 = vector.load %arg3[%c0_6, %c0_7] : memref<1x4xf32, #tpu.memory_space<vmem>>, vector<1x4xf32>
    %12 = vector.broadcast %11 : vector<1x4xf32> to vector<2x4xf32>
    %13 = arith.addf %10, %12 : vector<2x4xf32>
    %cst_8 = arith.constant 0.000000e+00 : f32
    %14 = vector.broadcast %cst_8 : f32 to vector<2x4xf32>
    %15 = arith.maximumf %13, %14 : vector<2x4xf32>
    %16 = vector.shape_cast %15 : vector<2x4xf32> to vector<2x4x1xf32>
    %c0_9 = arith.constant 0 : index
    %c0_10 = arith.constant 0 : index
    %17 = vector.load %arg4[%c0_9, %c0_10] : memref<4x4xf32, #tpu.memory_space<vmem>>, vector<4x4xf32>
    %18 = vector.shape_cast %17 : vector<4x4xf32> to vector<1x4x4xf32>
    %19 = vector.broadcast %16 : vector<2x4x1xf32> to vector<2x4x4xf32>
    %20 = vector.broadcast %18 : vector<1x4x4xf32> to vector<2x4x4xf32>
    %21 = arith.mulf %19, %20 : vector<2x4x4xf32>
    %cst_11 = arith.constant dense<0.000000e+00> : vector<2x4xf32>
    %22 = vector.multi_reduction <add>, %21, %cst_11 [1] : vector<2x4x4xf32> to vector<2x4xf32>
    %c0_12 = arith.constant 0 : index
    %c0_13 = arith.constant 0 : index
    %23 = vector.load %arg5[%c0_12, %c0_13] : memref<1x4xf32, #tpu.memory_space<vmem>>, vector<1x4xf32>
    %24 = vector.broadcast %23 : vector<1x4xf32> to vector<2x4xf32>
    %25 = arith.addf %22, %24 : vector<2x4xf32>
    %26 = arith.negf %25 : vector<2x4xf32>
    %27 = math.exp %26 : vector<2x4xf32>
    %cst_14 = arith.constant 1.000000e+00 : f32
    %28 = vector.broadcast %cst_14 : f32 to vector<2x4xf32>
    %29 = arith.addf %28, %27 : vector<2x4xf32>
    %30 = arith.divf %28, %29 : vector<2x4xf32>
    %c0_15 = arith.constant 0 : index
    %c0_16 = arith.constant 0 : index
    %c0_17 = arith.constant 0 : index
    %31 = vector.load %arg1[%c0_15, %c0_16, %c0_17] : memref<2x4x256xf32, #tpu.memory_space<vmem>>, vector<2x4x256xf32>
    %32 = vector.shape_cast %30 : vector<2x4xf32> to vector<2x4x1xf32>
    %33 = vector.broadcast %32 : vector<2x4x1xf32> to vector<2x4x256xf32>
    %34 = arith.mulf %31, %33 : vector<2x4x256xf32>
    %c0_18 = arith.constant 0 : index
    %c0_19 = arith.constant 0 : index
    %c0_20 = arith.constant 0 : index
    %35 = vector.load %arg6[%c0_18, %c0_19, %c0_20] : memref<2x4x256xf32, #tpu.memory_space<vmem>>, vector<2x4x256xf32>
    tpu.vector_store %arg6[%c0_18, %c0_19, %c0_20], %34 {strides = array<i32>} : memref<2x4x256xf32, #tpu.memory_space<vmem>>, vector<2x4x256xf32>,
    return
  }
  func.func @transform_0(%arg0: i32) -> (i32, i32, i32) {
    %c0_i32 = arith.constant 0 : i32
    %c0_i32_0 = arith.constant 0 : i32
    %c0_i32_1 = arith.constant 0 : i32
    return %arg0, %c0_i32, %c0_i32_0 : i32, i32, i32
  }
  func.func @transform_1(%arg0: i32) -> (i32, i32) {
    %c0_i32 = arith.constant 0 : i32
    %c0_i32_0 = arith.constant 0 : i32
    %c0_i32_1 = arith.constant 0 : i32
    return %c0_i32, %c0_i32_0 : i32, i32
  }
  func.func @transform_2(%arg0: i32) -> (i32, i32) {
    %c0_i32 = arith.constant 0 : i32
    %c0_i32_0 = arith.constant 0 : i32
    %c0_i32_1 = arith.constant 0 : i32
    return %c0_i32, %c0_i32_0 : i32, i32
  }
  func.func @transform_3(%arg0: i32) -> (i32, i32) {
    %c0_i32 = arith.constant 0 : i32
    %c0_i32_0 = arith.constant 0 : i32
    %c0_i32_1 = arith.constant 0 : i32
    return %c0_i32, %c0_i32_0 : i32, i32
  }
  func.func @transform_4(%arg0: i32) -> (i32, i32) {
    %c0_i32 = arith.constant 0 : i32
    %c0_i32_0 = arith.constant 0 : i32
    %c0_i32_1 = arith.constant 0 : i32
    return %c0_i32, %c0_i32_0 : i32, i32
  }
  func.func @transform_5(%arg0: i32) -> (i32, i32, i32) {
    %c0_i32 = arith.constant 0 : i32
    %c0_i32_0 = arith.constant 0 : i32
    %c0_i32_1 = arith.constant 0 : i32
    return %arg0, %c0_i32, %c0_i32_0 : i32, i32, i32
  }
}

</mosaic_0001>

<bundles_post_ra>
// kernel: se_forward.1
= control target key start
LH: loop header
LB: loop body
LE: loop exit
PB: predicated region body
PF: predicated region fallthrough
CT: control target
= control target key end

     0   :  { %vm28_vm0 = vcmask 1043456   ;;  %vm44_vm1 = vcmask 27648   ;;  %v70_v23 = vlaneseq  ;;  %s248_s0 = inlined_call_operand.vmem [shape: f32[2,4,256], index: 0, kind: input, shape index: {}]   ;;  %s249_s1 = inlined_call_operand.vmem [shape: f32[4,4], index: 1, kind: input, shape index: {}]   ;;  %s250_s2 = inlined_call_operand.vmem [shape: f32[1,4], index: 2, kind: input, shape index: {}]   ;;  %s251_s3 = inlined_call_operand.vmem [shape: f32[4,4], index: 3, kind: input, shape index: {}]   ;;  %s252_s4 = inlined_call_operand.vmem [shape: f32[1,4], index: 4, kind: input, shape index: {}]   ;;  %s253_s5 = inlined_call_operand.vmem [shape: f32[2,4,256], index: 5, kind: output, shape index: {}]  }
   0x1   :  { %v211_v0 = vld [vmem:[%s248_s0] sm:$0xff]  ;;  %v216_v1 = vld [vmem:[%s248_s0 + $0x8] sm:$0xff] }
   0x2   :  { %v24_v2 = vcombine.high %v211_v0, %v211_v0  ;;  %v29_v3 = vsel %vm28_vm0, %v211_v0, 0.0  ;;  %v25_v4 = vcombine.high %v216_v1, %v216_v1  ;;  %v34_v6 = vsel %vm28_vm0, %v216_v1, 0.0  ;;  %v41_v10 = vld [vmem:[%s249_s1] sm:$0xf] }
   0x3   :  { %v71_v28 = vshrl.u32 %v70_v23, 7  ;;  %v162_v29 = vld [vmem:[%s250_s2] ss:$0 sm:$0xff] }
   0x4   :  { %v30_v5 = vsel %vm28_vm0, %v24_v2, 0.0  ;;  %v35_v7 = vsel %vm28_vm0, %v25_v4, 0.0  ;;  %v84_v41 = vld [vmem:[%s251_s3] sm:$0xf] }
   0x5   :  { %v31_v8 = vadd.f32 %v30_v5, %v29_v3  ;;  %v36_v9 = vadd.f32 %v35_v7, %v34_v6  ;;  %v72_v33 = vsub.s32 0, %v71_v28  ;;  %v163_v56 = vld [vmem:[%s252_s4] ss:$0 sm:$0xff] }
   0x7   :  { %32 = vadd.xlane.f32.xlu0 %v31_v8 }
   0xb   :  { %37 = vadd.xlane.f32.xlu0 %v36_v9 }
  0x94   :  { %v33_v11 = vpop.xlane.xlu0 %32 }
  0x95   :  { %v39_v12 = vmul.f32 0.00390625, %v33_v11  ;;  %v177_v11 = vmov 839922192  }
  0x97   :  { %v42_v13 = vmul.f32 %v41_v10, %v39_v12  ;;  %v139_v12 = vunpack.c.l.s4 %v177_v11 }
  0x98   :  { %v38_v14 = vpop.xlane.xlu0 %37 }
  0x99   :  { %v45_v15 = vsel %vm44_vm1, %v42_v13, 0.0  ;;  %v40_v16 = vmul.f32 0.00390625, %v38_v14  ;;  %v140_v13 = vunpack.c.0.s8 %v139_v12 }
  0x9a   :  { %v46_v17 = vrot.slane %v45_v15, 4 }
  0x9b   :  { %v43_v18 = vmul.f32 %v41_v10, %v40_v16  ;;  %v143_v14 = vsub.s32 %v140_v13, %v71_v28 }
  0x9c   :  { %v47_v19 = vadd.f32 %v46_v17, %v45_v15 }
  0x9d   :  { %v52_v20 = vsel %vm44_vm1, %v43_v18, 0.0 }
  0x9e   :  { %v48_v21 = vrot.slane %v47_v19, 2  ;;  %v53_v22 = vrot.slane %v52_v20, 4 }
  0xa0   :  { %v54_v24 = vadd.f32 %v53_v22, %v52_v20  ;;  %v49_v25 = vadd.f32 %v48_v21, %v47_v19 }
  0xa2   :  { %v55_v26 = vrot.slane %v54_v24, 2  ;;  %v50_v27 = vrot.slane %v49_v25, 1 }
  0xa4   :  { %v56_v30 = vadd.f32 %v55_v26, %v54_v24  ;;  %v51_v31 = vadd.f32 %v50_v27, %v49_v25 }
  0xa6   :  { %v66_v32 = vadd.f32 %v162_v29, %v51_v31  ;;  %v57_v34 = vrot.slane %v56_v30, 1 }
  0xa8   :  { %v68_v35 = vmax.f32 %v66_v32, 0.0  ;;  %v58_v36 = vadd.f32 %v57_v34, %v56_v30 }
  0xaa   :  { %v73_v37 = vrot.slane %v68_v35, %v72_v33  ;;  %v67_v38 = vadd.f32 %v162_v29, %v58_v36 }
  0xac   :  { %75 = vbcast.lane.b32.xlu1 %v73_v37, 256  ;;  %v69_v39 = vmax.f32 %v67_v38, 0.0 }
  0xae   :  { %v80_v40 = vrot.slane %v69_v39, %v72_v33 }
  0xb0   :  { %82 = vbcast.lane.b32.xlu1 %v80_v40, 256 }
 0x11e   :  { %v76_v42 = vpop.permute.xlu1 %75 }
 0x11f   :  { %v85_v43 = vmul.f32 %v84_v41, %v76_v42 }
 0x121   :  { %v87_v44 = vsel %vm44_vm1, %v85_v43, 0.0 }
 0x122   :  { %v88_v45 = vrot.slane %v87_v44, 4  ;;  %v83_v46 = vpop.permute.xlu1 %82 }
 0x123   :  { %v86_v47 = vmul.f32 %v84_v41, %v83_v46 }
 0x124   :  { %v89_v48 = vadd.f32 %v88_v45, %v87_v44 }
 0x125   :  { %v94_v49 = vsel %vm44_vm1, %v86_v47, 0.0 }
 0x126   :  { %v90_v50 = vrot.slane %v89_v48, 2  ;;  %v95_v51 = vrot.slane %v94_v49, 4 }
 0x128   :  { %v91_v52 = vadd.f32 %v90_v50, %v89_v48  ;;  %v96_v53 = vadd.f32 %v95_v51, %v94_v49 }
 0x12a   :  { %v92_v54 = vrot.slane %v91_v52, 1  ;;  %v97_v55 = vrot.slane %v96_v53, 2 }
 0x12c   :  { %v93_v57 = vadd.f32 %v92_v54, %v91_v52  ;;  %v98_v58 = vadd.f32 %v97_v55, %v96_v53 }
 0x12e   :  { %v108_v59 = vadd.f32 %v163_v56, %v93_v57  ;;  %v99_v60 = vrot.slane %v98_v58, 1 }
 0x130   :  { %v164_v61 = vmul.f32 -1.442695, %v108_v59  ;;  %v100_v62 = vadd.f32 %v99_v60, %v98_v58 }
 0x132   :  { %169 = vpow2.f32 %v164_v61  ;;  %v109_v63 = vadd.f32 %v163_v56, %v100_v62 }
 0x134   :  { %v165_v2 = vmul.f32 -1.442695, %v109_v63 }
 0x136   :  { %171 = vpow2.f32 %v165_v2 }
 0x13c   :  { %v170_v3 = vpop.eup %169 }
 0x13d   :  { %v116_v4 = vadd.f32 1.0, %v170_v3 }
 0x13f   :  { %173 = vrcp.f32 %v116_v4 }
 0x140   :  { %v172_v5 = vpop.eup %171 }
 0x141   :  { %v117_v6 = vadd.f32 1.0, %v172_v5 }
 0x143   :  { %175 = vrcp.f32 %v117_v6 }
 0x149   :  { %v174_v7 = vpop.eup %173 }
 0x14a   :  { %v125_v8 = vrot.slane %v174_v7, %v72_v33 }
 0x14c   :  { %127 = vbcast.lane.b32.xlu0 %v125_v8, 256 }
 0x14d   :  { %v176_v9 = vpop.eup %175 }
 0x14e   :  { %v132_v10 = vrot.slane %v176_v9, %v72_v33 }
 0x150   :  { %134 = vbcast.lane.b32.xlu1 %v132_v10, 256 }
 0x1be   :  { %v128_v15 = vpop.permute.xlu0 %127 }
 0x1bf   :  { %v144_v16 = vrot.slane %v128_v15, %v143_v14 }
 0x1c1   :  { %v154_v17 = vmul.f32 %v144_v16, %v211_v0 }
 0x1c2   :  { %v135_v18 = vpop.permute.xlu1 %134 }
 0x1c3   :  { %156 = vst [vmem:[%s253_s5] sm:$0xff] %v154_v17  ;;  %v151_v19 = vrot.slane %v135_v18, %v143_v14 }
 0x1c5   :  { %v155_v20 = vmul.f32 %v151_v19, %v216_v1 }
 0x1c7   :  { %157 = vst [vmem:[%s253_s5 + $0x8] sm:$0xff] %v155_v20 }

</bundles_post_ra>
